<compile_context>
chip_gen: v6e
topology: v6e:2x2x1
jax: 0.10.0
libtpu: 0.0.40
codegen_flags: <defaults>
</compile_context>

<pallas_src>
import functools

import jax
import jax.numpy as jnp
from jax.experimental import pallas as pl
from jax.experimental.pallas import tpu as pltpu

_LANE = 128
_VMEM_LIMIT = 48 * 1024 * 1024        # explicit scoped-VMEM cap (safe on v5e/v6e/v7x)
_FUSED_VMEM_CAP = 40 * 1024 * 1024    # switch to the tiled path above this estimate


# ---------------------------------------------------------------------------
# Fused whole-graph kernel (small-graph fast path: A, h, W all VMEM-resident).
# ---------------------------------------------------------------------------
def fused_gnn_kernel(a_ref, dinv_ref, x_ref, wl_ref, wr_ref, b_ref, o_ref):
    """All 3 SAGE layers fused; intermediates never leave VMEM.

    a_ref    : [N, N]       bf16 0/1 edge counts (dst rows, src cols)
    dinv_ref : [N, 1]       f32  1/in-degree (0-degree rows -> 1, agg stays 0)
    x_ref    : [N, Hp]      bf16 input features (zero-padded to lane-dense Hp)
    wl_ref   : [L, Hp, Hp]  bf16 Wl^T per layer (neighbor weight)
    wr_ref   : [L, Hp, Hp]  bf16 Wr^T per layer (root weight)
    b_ref    : [L, 1, Hp]   f32  biases
    o_ref    : [N, Hp]      f32  output features (lane-dense store)
    """
    num_layers = wl_ref.shape[0]
    a = a_ref[...]
    dinv = dinv_ref[...]
    h = x_ref[...]                               # bf16 carry across layers
    for layer in range(num_layers):              # static unroll (L == 3)
        # mean aggregation: MXU matmul (f32 accumulate) + free VPU row scale
        agg = jnp.dot(a, h, preferred_element_type=jnp.float32) * dinv
        # two MXU matmuls into the same f32 accumulator (no concat copy)
        z = jnp.dot(agg.astype(jnp.bfloat16), wl_ref[layer],
                    preferred_element_type=jnp.float32)
        z = z + jnp.dot(h, wr_ref[layer], preferred_element_type=jnp.float32)
        z = z + b_ref[layer]
        z = jnp.maximum(z, 0.0)
        if layer + 1 < num_layers:
            h = z.astype(jnp.bfloat16)           # single cast per layer
        else:
            o_ref[...] = z                       # final f32, lane-dense


def fused_gnn(a, dinv, xp, wl, wr, b):
    n = a.shape[0]
    hp = xp.shape[1]
    num_layers = wl.shape[0]
    return pl.pallas_call(
        fused_gnn_kernel,
        out_shape=jax.ShapeDtypeStruct((n, hp), jnp.float32),
        in_specs=[
            pl.BlockSpec((n, n), lambda: (0, 0)),
            pl.BlockSpec((n, 1), lambda: (0, 0)),
            pl.BlockSpec((n, hp), lambda: (0, 0)),
            pl.BlockSpec((num_layers, hp, hp), lambda: (0, 0, 0)),
            pl.BlockSpec((num_layers, hp, hp), lambda: (0, 0, 0)),
            pl.BlockSpec((num_layers, 1, hp), lambda: (0, 0, 0)),
        ],
        out_specs=pl.BlockSpec((n, hp), lambda: (0, 0)),
        compiler_params=pltpu.CompilerParams(vmem_limit_bytes=_VMEM_LIMIT),
    )(a, dinv, xp, wl, wr, b)


# ---------------------------------------------------------------------------
# Tiled per-layer kernel (large-graph path: A streamed from HBM, dst tiles
# "parallel" for megacore / v7x second TC, src reduction "arbitrary").
# ---------------------------------------------------------------------------
def sage_layer_tiled_kernel(a_ref, hsrc_ref, hdst_ref, dinv_ref,
                            wl_ref, wr_ref, b_ref, o_ref, acc_ref):
    k = pl.program_id(1)

    @pl.when(k == 0)
    def _():
        acc_ref[...] = jnp.zeros_like(acc_ref)

    acc_ref[...] += jnp.dot(a_ref[...], hsrc_ref[...],
                            preferred_element_type=jnp.float32)

    @pl.when(k == pl.num_programs(1) - 1)
    def _():
        agg = (acc_ref[...] * dinv_ref[...]).astype(jnp.bfloat16)
        z = jnp.dot(agg, wl_ref[...], preferred_element_type=jnp.float32)
        z = z + jnp.dot(hdst_ref[...], wr_ref[...],
                        preferred_element_type=jnp.float32)
        z = z + b_ref[...]
        o_ref[...] = jnp.maximum(z, 0.0).astype(o_ref.dtype)


def sage_layer_tiled(a, h, dinv, wl, wr, b, *, out_dtype, tm, tk):
    n, hp = h.shape
    grid = (n // tm, n // tk)
    return pl.pallas_call(
        sage_layer_tiled_kernel,
        out_shape=jax.ShapeDtypeStruct((n, hp), out_dtype),
        grid_spec=pltpu.PrefetchScalarGridSpec(
            num_scalar_prefetch=0,
            grid=grid,
            in_specs=[
                # A tiles are the only large stream -> deeper buffering
                pl.BlockSpec((tm, tk), lambda i, k: (i, k),
                             pipeline_mode=pl.Buffered(3)),
                pl.BlockSpec((tk, hp), lambda i, k: (k, 0)),   # h (src rows)
                pl.BlockSpec((tm, hp), lambda i, k: (i, 0)),   # h (dst rows)
                pl.BlockSpec((tm, 1), lambda i, k: (i, 0)),    # 1/deg
                pl.BlockSpec((hp, hp), lambda i, k: (0, 0)),   # Wl^T (resident)
                pl.BlockSpec((hp, hp), lambda i, k: (0, 0)),   # Wr^T (resident)
                pl.BlockSpec((1, hp), lambda i, k: (0, 0)),    # bias
            ],
            out_specs=pl.BlockSpec((tm, hp), lambda i, k: (i, 0)),
            scratch_shapes=[pltpu.VMEM((tm, hp), jnp.float32)],
        ),
        compiler_params=pltpu.CompilerParams(
            dimension_semantics=("parallel", "arbitrary"),
            vmem_limit_bytes=_VMEM_LIMIT,
        ),
    )(a, h, h, dinv, wl, wr, b)


def tiled_gnn(a, dinv, xp, wl, wr, b, *, tm, tk):
    num_layers = wl.shape[0]
    h = xp
    for layer in range(num_layers):
        last = layer + 1 == num_layers
        h = sage_layer_tiled(
            a, h, dinv, wl[layer], wr[layer], b[layer],
            out_dtype=jnp.float32 if last else jnp.bfloat16,
            tm=tm, tk=tk)
    return h


# ---------------------------------------------------------------------------
# Preprocessing / dispatch.
# ---------------------------------------------------------------------------
def build_adjacency(edge_index, num_nodes):
    """Dense 0/1 edge-count matrix (dst rows) and f32 inverse in-degree."""
    src = edge_index[0]
    dst = edge_index[1]
    a = jnp.zeros((num_nodes, num_nodes), jnp.float32)
    a = a.at[dst, src].add(1.0)
    deg = a.sum(axis=1, keepdims=True)
    dinv = 1.0 / jnp.maximum(deg, 1.0)
    return a, dinv


def prepare_gnn(edge_index, num_nodes, params):
    """One-time preprocessing hoisted out of the forward path.

    Weights/biases are zero-padded to a lane-dense feature dim (multiple of
    128); zero padding is exact for this network (padded channels stay 0).
    """
    a01, dinv = build_adjacency(edge_index, num_nodes)
    h = params[0][0].shape[0]
    hp = max(_LANE, ((h + _LANE - 1) // _LANE) * _LANE)
    pad = hp - h

    def pad_w(w):                           # [H, H] -> [Hp, Hp]
        return jnp.pad(w, ((0, pad), (0, pad)))

    wl = jnp.stack([pad_w(Wl.T) for (Wl, _, _) in params]).astype(jnp.bfloat16)
    wr = jnp.stack([pad_w(Wr.T) for (_, Wr, _) in params]).astype(jnp.bfloat16)
    bb = jnp.stack([jnp.pad(b, (0, pad)).reshape(1, hp)
                    for (_, _, b) in params]).astype(jnp.float32)
    return a01.astype(jnp.bfloat16), dinv.astype(jnp.float32), wl, wr, bb


def _fused_vmem_estimate(n, hp, num_layers):
    a = n * n * 2
    x = n * hp * 2
    w = 2 * num_layers * hp * hp * 2
    bias = num_layers * hp * 4
    out = n * hp * 4
    work = 4 * n * hp * 4
    return 2 * (a + x + w + bias + out) + work


def _pick_tile(n, candidates):
    for c in candidates:
        if c <= n and n % c == 0:
            return c
    return n


@jax.jit
def gnn_forward(x, a, dinv, wl, wr, b):
    """relu(SAGE(relu(SAGE(relu(SAGE(x)))))) using the Pallas kernels."""
    n, h_in = x.shape
    hp = wl.shape[-1]
    num_layers = wl.shape[0]
    xp = jnp.pad(x.astype(jnp.bfloat16), ((0, 0), (0, hp - h_in)))
    if _fused_vmem_estimate(n, hp, num_layers) <= _FUSED_VMEM_CAP:
        out = fused_gnn(a, dinv, xp, wl, wr, b)
    else:
        tm = _pick_tile(n, (512, 256, 128, 64, 32, 16))
        tk = _pick_tile(n, (1024, 512, 256, 128))
        out = tiled_gnn(a, dinv, xp, wl, wr, b, tm=tm, tk=tk)
    return out[:, :h_in]


def run_tiled(x, a, dinv, wl, wr, b, *, tm, tk):
    """Direct entry to the tiled path (exercised in the demo for coverage)."""
    n, h_in = x.shape
    hp = wl.shape[-1]
    xp = jnp.pad(x.astype(jnp.bfloat16), ((0, 0), (0, hp - h_in)))
    return tiled_gnn(a, dinv, xp, wl, wr, b, tm=tm, tk=tk)[:, :h_in]


# ---------------------------------------------------------------------------
# Pure-JAX references.
# ---------------------------------------------------------------------------
def gnn_reference_f32(x, edge_index, params):
    a01, dinv = build_adjacency(edge_index, x.shape[0])
    a = a01 * dinv
    h = x
    for (Wl, Wr, b) in params:
        agg = a @ h
        h = jnp.maximum(agg @ Wl.T + h @ Wr.T + b, 0.0)
    return h


def gnn_reference_bf16(x, edge_index, params):
    """Mirrors the kernel arithmetic (bf16 inputs, f32 accumulate, f32 1/deg)."""
    a01, dinv = build_adjacency(edge_index, x.shape[0])
    a = a01.astype(jnp.bfloat16)
    h = x.astype(jnp.bfloat16)
    z = None
    for (Wl, Wr, b) in params:
        agg = jnp.dot(a, h, preferred_element_type=jnp.float32) * dinv
        z = jnp.dot(agg.astype(jnp.bfloat16), Wl.T.astype(jnp.bfloat16),
                    preferred_element_type=jnp.float32)
        z = z + jnp.dot(h, Wr.T.astype(jnp.bfloat16),
                        preferred_element_type=jnp.float32)
        z = jnp.maximum(z + b, 0.0)
        h = z.astype(jnp.bfloat16)
    return z


def init_params(key, hidden_channels, num_layers=3):
    params = []
    for _ in range(num_layers):
        k1, k2, k3, key = jax.random.split(key, 4)
        scale = 1.0 / jnp.sqrt(hidden_channels)
        Wl = jax.random.uniform(
            k1, (hidden_channels, hidden_channels), jnp.float32, -scale, scale)
        Wr = jax.random.uniform(
            k2, (hidden_channels, hidden_channels), jnp.float32, -scale, scale)
        b = jax.random.uniform(
            k3, (hidden_channels,), jnp.float32, -scale, scale)
        params.append((Wl, Wr, b))
    return params


if __name__ == "__main__":
    key = jax.random.PRNGKey(0)
    k_x, k_e, k_p = jax.random.split(key, 3)

    num_nodes = 64
    hidden_channels = 32
    num_edges = 256

    x = jax.random.normal(k_x, (num_nodes, hidden_channels), jnp.float32)
    edge_index = jax.random.randint(k_e, (2, num_edges), 0, num_nodes, jnp.int32)
    params = init_params(k_p, hidden_channels)

    # One-time preprocessing (0/1 adjacency + 1/deg + padded/transposed weights).
    a, dinv, wl, wr, b = prepare_gnn(edge_index, num_nodes, params)

    # Fused single-call path (what gnn_forward dispatches to at this size).
    out = jax.block_until_ready(gnn_forward(x, a, dinv, wl, wr, b))
    assert out.shape == (num_nodes, hidden_channels)

    # Tight check vs a reference mirroring the kernel's bf16/f32 arithmetic.
    ref_bf16 = gnn_reference_bf16(x, edge_index, params)
    assert jnp.allclose(out, ref_bf16, atol=2e-3, rtol=2e-3), \
        "mismatch vs bf16-mirror reference"

    # Loose sanity check vs full-f32 PyG semantics.
    ref_f32 = gnn_reference_f32(x, edge_index, params)
    assert jnp.allclose(out, ref_f32, atol=1e-1, rtol=1e-1), \
        "mismatch vs f32 reference"

    # Exercise the tiled (large-graph) path as well and check consistency.
    tiled_fn = jax.jit(functools.partial(run_tiled, tm=32, tk=64))
    out_tiled = jax.block_until_ready(tiled_fn(x, a, dinv, wl, wr, b))
    assert out_tiled.shape == (num_nodes, hidden_channels)
    assert jnp.allclose(out_tiled, out, atol=2e-3, rtol=2e-3), \
        "tiled path mismatch vs fused path"

    print("KERNEL_OK")
</pallas_src>

<mosaic_0001>
module attributes {stable_mosaic.version = 11 : i64} {
  func.func @fused_gnn_kernel(%arg0: memref<64x64xbf16, #tpu.memory_space<vmem>>, %arg1: memref<64x1xf32, #tpu.memory_space<vmem>>, %arg2: memref<64x128xbf16, #tpu.memory_space<vmem>>, %arg3: memref<3x128x128xbf16, #tpu.memory_space<vmem>>, %arg4: memref<3x128x128xbf16, #tpu.memory_space<vmem>>, %arg5: memref<3x1x128xf32, #tpu.memory_space<vmem>>, %arg6: memref<64x128xf32, #tpu.memory_space<vmem>>) attributes {dimension_semantics = [], scalar_prefetch = 0 : i64, scratch_operands = 0 : i64, tpu.core_type = #tpu.core_type<tc>} {
    %c0 = arith.constant 0 : index
    %c0_0 = arith.constant 0 : index
    %0 = vector.load %arg0[%c0, %c0_0] : memref<64x64xbf16, #tpu.memory_space<vmem>>, vector<64x64xbf16>
    %c0_1 = arith.constant 0 : index
    %c0_2 = arith.constant 0 : index
    %1 = vector.load %arg1[%c0_1, %c0_2] : memref<64x1xf32, #tpu.memory_space<vmem>>, vector<64x1xf32>
    %c0_3 = arith.constant 0 : index
    %c0_4 = arith.constant 0 : index
    %2 = vector.load %arg2[%c0_3, %c0_4] : memref<64x128xbf16, #tpu.memory_space<vmem>>, vector<64x128xbf16>
    %cst = arith.constant dense<0.000000e+00> : vector<64x128xf32>
    %3 = tpu.matmul %0, %2, %cst {dimension_numbers = #tpu.dot_dimension_numbers<[1], [0], [0], [1], [0, 0, 1, 1], [], []>} : vector<64x64xbf16>, vector<64x128xbf16>, vector<64x128xf32> -> vector<64x128xf32>
    %4 = vector.broadcast %1 : vector<64x1xf32> to vector<64x128xf32>
    %5 = arith.mulf %3, %4 : vector<64x128xf32>
    %6 = arith.truncf %5 : vector<64x128xf32> to vector<64x128xbf16>
    %c0_5 = arith.constant 0 : index
    %c0_6 = arith.constant 0 : index
    %c0_7 = arith.constant 0 : index
    %7 = vector.load %arg3[%c0_5, %c0_6, %c0_7] : memref<3x128x128xbf16, #tpu.memory_space<vmem>>, vector<1x128x128xbf16>
    %8 = vector.shape_cast %7 : vector<1x128x128xbf16> to vector<128x128xbf16>
    %cst_8 = arith.constant dense<0.000000e+00> : vector<64x128xf32>
    %9 = tpu.matmul %6, %8, %cst_8 {dimension_numbers = #tpu.dot_dimension_numbers<[1], [0], [0], [1], [0, 0, 1, 1], [], []>} : vector<64x128xbf16>, vector<128x128xbf16>, vector<64x128xf32> -> vector<64x128xf32>
    %c0_9 = arith.constant 0 : index
    %c0_10 = arith.constant 0 : index
    %c0_11 = arith.constant 0 : index
    %10 = vector.load %arg4[%c0_9, %c0_10, %c0_11] : memref<3x128x128xbf16, #tpu.memory_space<vmem>>, vector<1x128x128xbf16>
    %11 = vector.shape_cast %10 : vector<1x128x128xbf16> to vector<128x128xbf16>
    %cst_12 = arith.constant dense<0.000000e+00> : vector<64x128xf32>
    %12 = tpu.matmul %2, %11, %cst_12 {dimension_numbers = #tpu.dot_dimension_numbers<[1], [0], [0], [1], [0, 0, 1, 1], [], []>} : vector<64x128xbf16>, vector<128x128xbf16>, vector<64x128xf32> -> vector<64x128xf32>
    %13 = arith.addf %9, %12 : vector<64x128xf32>
    %c0_13 = arith.constant 0 : index
    %c0_14 = arith.constant 0 : index
    %c0_15 = arith.constant 0 : index
    %14 = vector.load %arg5[%c0_13, %c0_14, %c0_15] : memref<3x1x128xf32, #tpu.memory_space<vmem>>, vector<1x1x128xf32>
    %15 = vector.shape_cast %14 : vector<1x1x128xf32> to vector<1x128xf32>
    %16 = vector.broadcast %15 : vector<1x128xf32> to vector<64x128xf32>
    %17 = arith.addf %13, %16 : vector<64x128xf32>
    %cst_16 = arith.constant 0.000000e+00 : f32
    %18 = vector.broadcast %cst_16 : f32 to vector<64x128xf32>
    %19 = arith.maximumf %17, %18 : vector<64x128xf32>
    %20 = arith.truncf %19 : vector<64x128xf32> to vector<64x128xbf16>
    %cst_17 = arith.constant dense<0.000000e+00> : vector<64x128xf32>
    %21 = tpu.matmul %0, %20, %cst_17 {dimension_numbers = #tpu.dot_dimension_numbers<[1], [0], [0], [1], [0, 0, 1, 1], [], []>} : vector<64x64xbf16>, vector<64x128xbf16>, vector<64x128xf32> -> vector<64x128xf32>
    %22 = vector.broadcast %1 : vector<64x1xf32> to vector<64x128xf32>
    %23 = arith.mulf %21, %22 : vector<64x128xf32>
    %24 = arith.truncf %23 : vector<64x128xf32> to vector<64x128xbf16>
    %c1 = arith.constant 1 : index
    %c0_18 = arith.constant 0 : index
    %c0_19 = arith.constant 0 : index
    %25 = vector.load %arg3[%c1, %c0_18, %c0_19] : memref<3x128x128xbf16, #tpu.memory_space<vmem>>, vector<1x128x128xbf16>
    %26 = vector.shape_cast %25 : vector<1x128x128xbf16> to vector<128x128xbf16>
    %cst_20 = arith.constant dense<0.000000e+00> : vector<64x128xf32>
    %27 = tpu.matmul %24, %26, %cst_20 {dimension_numbers = #tpu.dot_dimension_numbers<[1], [0], [0], [1], [0, 0, 1, 1], [], []>} : vector<64x128xbf16>, vector<128x128xbf16>, vector<64x128xf32> -> vector<64x128xf32>
    %c1_21 = arith.constant 1 : index
    %c0_22 = arith.constant 0 : index
    %c0_23 = arith.constant 0 : index
    %28 = vector.load %arg4[%c1_21, %c0_22, %c0_23] : memref<3x128x128xbf16, #tpu.memory_space<vmem>>, vector<1x128x128xbf16>
    %29 = vector.shape_cast %28 : vector<1x128x128xbf16> to vector<128x128xbf16>
    %cst_24 = arith.constant dense<0.000000e+00> : vector<64x128xf32>
    %30 = tpu.matmul %20, %29, %cst_24 {dimension_numbers = #tpu.dot_dimension_numbers<[1], [0], [0], [1], [0, 0, 1, 1], [], []>} : vector<64x128xbf16>, vector<128x128xbf16>, vector<64x128xf32> -> vector<64x128xf32>
    %31 = arith.addf %27, %30 : vector<64x128xf32>
    %c1_25 = arith.constant 1 : index
    %c0_26 = arith.constant 0 : index
    %c0_27 = arith.constant 0 : index
    %32 = vector.load %arg5[%c1_25, %c0_26, %c0_27] : memref<3x1x128xf32, #tpu.memory_space<vmem>>, vector<1x1x128xf32>
    %33 = vector.shape_cast %32 : vector<1x1x128xf32> to vector<1x128xf32>
    %34 = vector.broadcast %33 : vector<1x128xf32> to vector<64x128xf32>
    %35 = arith.addf %31, %34 : vector<64x128xf32>
    %cst_28 = arith.constant 0.000000e+00 : f32
    %36 = vector.broadcast %cst_28 : f32 to vector<64x128xf32>
    %37 = arith.maximumf %35, %36 : vector<64x128xf32>
    %38 = arith.truncf %37 : vector<64x128xf32> to vector<64x128xbf16>
    %cst_29 = arith.constant dense<0.000000e+00> : vector<64x128xf32>
    %39 = tpu.matmul %0, %38, %cst_29 {dimension_numbers = #tpu.dot_dimension_numbers<[1], [0], [0], [1], [0, 0, 1, 1], [], []>} : vector<64x64xbf16>, vector<64x128xbf16>, vector<64x128xf32> -> vector<64x128xf32>
    %40 = vector.broadcast %1 : vector<64x1xf32> to vector<64x128xf32>
    %41 = arith.mulf %39, %40 : vector<64x128xf32>
    %42 = arith.truncf %41 : vector<64x128xf32> to vector<64x128xbf16>
    %c2 = arith.constant 2 : index
    %c0_30 = arith.constant 0 : index
    %c0_31 = arith.constant 0 : index
    %43 = vector.load %arg3[%c2, %c0_30, %c0_31] : memref<3x128x128xbf16, #tpu.memory_space<vmem>>, vector<1x128x128xbf16>
    %44 = vector.shape_cast %43 : vector<1x128x128xbf16> to vector<128x128xbf16>
    %cst_32 = arith.constant dense<0.000000e+00> : vector<64x128xf32>
    %45 = tpu.matmul %42, %44, %cst_32 {dimension_numbers = #tpu.dot_dimension_numbers<[1], [0], [0], [1], [0, 0, 1, 1], [], []>} : vector<64x128xbf16>, vector<128x128xbf16>, vector<64x128xf32> -> vector<64x128xf32>
    %c2_33 = arith.constant 2 : index
    %c0_34 = arith.constant 0 : index
    %c0_35 = arith.constant 0 : index
    %46 = vector.load %arg4[%c2_33, %c0_34, %c0_35] : memref<3x128x128xbf16, #tpu.memory_space<vmem>>, vector<1x128x128xbf16>
    %47 = vector.shape_cast %46 : vector<1x128x128xbf16> to vector<128x128xbf16>
    %cst_36 = arith.constant dense<0.000000e+00> : vector<64x128xf32>
    %48 = tpu.matmul %38, %47, %cst_36 {dimension_numbers = #tpu.dot_dimension_numbers<[1], [0], [0], [1], [0, 0, 1, 1], [], []>} : vector<64x128xbf16>, vector<128x128xbf16>, vector<64x128xf32> -> vector<64x128xf32>
    %49 = arith.addf %45, %48 : vector<64x128xf32>
    %c2_37 = arith.constant 2 : index
    %c0_38 = arith.constant 0 : index
    %c0_39 = arith.constant 0 : index
    %50 = vector.load %arg5[%c2_37, %c0_38, %c0_39] : memref<3x1x128xf32, #tpu.memory_space<vmem>>, vector<1x1x128xf32>
    %51 = vector.shape_cast %50 : vector<1x1x128xf32> to vector<1x128xf32>
    %52 = vector.broadcast %51 : vector<1x128xf32> to vector<64x128xf32>
    %53 = arith.addf %49, %52 : vector<64x128xf32>
    %cst_40 = arith.constant 0.000000e+00 : f32
    %54 = vector.broadcast %cst_40 : f32 to vector<64x128xf32>
    %55 = arith.maximumf %53, %54 : vector<64x128xf32>
    %c0_41 = arith.constant 0 : index
    %c0_42 = arith.constant 0 : index
    %56 = vector.load %arg6[%c0_41, %c0_42] : memref<64x128xf32, #tpu.memory_space<vmem>>, vector<64x128xf32>
    tpu.vector_store %arg6[%c0_41, %c0_42], %55 {strides = array<i32>} : memref<64x128xf32, #tpu.memory_space<vmem>>, vector<64x128xf32>,
    return
  }
}

</mosaic_0001>

<bundles_post_ra>
// kernel: gnn_forward.1
= control target key start
LH: loop header
LB: loop body
LE: loop exit
PB: predicated region body
PF: predicated region fallthrough
CT: control target
= control target key end

     0   :  { %11 = vsyncpa [#allocation3], 0  ;;  %s1737_s21 = smov [#allocation2]   ;;  %s2019_s0 = inlined_call_operand.vmem [shape: bf16[64,64], index: 0, kind: input, shape index: {}]   ;;  %s2020_s1 = inlined_call_operand.vmem [shape: f32[64,1], index: 1, kind: input, shape index: {}]   ;;  %s2021_s2 = inlined_call_operand.vmem [shape: bf16[64,128], index: 2, kind: input, shape index: {}]   ;;  %s2022_s3 = inlined_call_operand.vmem [shape: bf16[3,128,128], index: 3, kind: input, shape index: {}]   ;;  %s2023_s4 = inlined_call_operand.hbm [shape: bf16[3,128,128], index: 4, kind: input, shape index: {}]   ;;  %s2024_s5 = inlined_call_operand.vmem [shape: f32[3,1,128], index: 5, kind: input, shape index: {}]   ;;  %s2025_s6 = inlined_call_operand.vmem [shape: f32[64,128], index: 6, kind: output, shape index: {}]  }
   0x1   :  { %s25_s22 = sshll.u32 %s1737_s21, 4  ;;  %s26_s22 = int_to_ptr.vmem [resolvable:$true] %s25_s22 }
   0x2   :  { %s1723_s23 = scalar_lea.vmem %s26_s22, 3072  ;;  %p1728_p1 = scmp.lt.s32.totalorder %s26_s22, %s26_s22 }
   0x3   :  { %p1724_p0 = scmp.ne.s32.totalorder %s26_s22, %s1723_s23  ;;  %p1729_p2 = scmp.lt.s32.totalorder %s1723_s23, %s1723_s23 }
   0x5   :  { %p1730_p3 = por %p1729_p2, %p1728_p1 }
   0x7   :  { %p1731_p4 = pnand %p1730_p3, %p1724_p0 }
   0x9   :  { %1734 = shalt.err (!%p1731_p4)
}
   0xa   :  { %s1738_s24 = smov 64   ;;  %s1739_s25 = smov 4  }
   0xb   :  { %31 = dma.hbm_to_vmem [thread:$0]  %s2023_s4, 3072, %s26_s22, [#allocation3], %s1738_s24, %s1738_s24, %s1739_s25  }
   0xc   :  { %1735 = dma.done.wait [#allocation3], 3072  }
   0xd   :  { %1736 = vsyncadd [#allocation3], 4294964224  ;;  %v1740_v0 = vmov 0   ;;  %v1782_v1 = vld [vmem:[%s2021_s2 + $0x18] sm:$0xff]   ;;  %v1787_v2 = vld [vmem:[%s2021_s2 + $0x10] sm:$0xff]   ;;  %vm106_vm0 = vcmask 523264  }
   0xe   :  { %1657 = vset.pattern.permute.xlu0 %v1740_v0  ;;  %1658 = vset.pattern.permute.xlu1 %v1740_v0  ;;  %v1793_v3 = vld [vmem:[%s2021_s2 + $0x8] sm:$0xff]   ;;  %v1662_v4 = vld [vmem:[%s2021_s2] sm:$0xff]   ;;  %v48_v7 = vld [vmem:[%s2020_s1 + $0x10] sm:$0xff] }
   0xf   :  { %1461 = vmatprep.subr.bf16.mxu0 %v1782_v1  ;;  %v1803_v5 = vld [vmem:[%s2019_s0] sm:$0xff]   ;;  %1493 = vmatprep.mubr.bf16.mxu1 %v1662_v4  ;;  %v47_v8 = vld [vmem:[%s2020_s1 + $0x8] sm:$0xff]  ;;  %v49_v9 = vld [vmem:[%s2020_s1 + $0x18] sm:$0xff] }
  0x10   :  { %1462 = vmatpush3.bf16.msra.mxu0 %v1782_v1  ;;  %1469 = vmatprep.mubr.msk.bf16.mxu0 %vm106_vm0, %v1803_v5  ;;  %v46_v6 = vld [vmem:[%s2020_s1] sm:$0xff]  ;;  %v1667_v10 = vld [vmem:[#allocation2 + $0x38] sm:$0xff]   ;;  %v1825_v11 = vld [vmem:[%s2019_s0 + $0x8] sm:$0xff]  }
  0x11   :  { %1463 = vmatprep.subr.bf16.mxu0 %v1787_v2  ;;  %186 = vperm.xlu0 %1657, %v46_v6   ;;  %v50_v12 = vld [vmem:[%s2020_s1 + $0x20] sm:$0xff]  ;;  %v1668_v13 = vld [vmem:[#allocation2 + $0x30] sm:$0xff]   ;;  %v1669_v14 = vld [vmem:[%s2022_s3 + $0x38] sm:$0xff]  }
  0x12   :  { %196 = vperm.xlu1 %1658, %v48_v7   ;;  %v51_v15 = vld [vmem:[%s2020_s1 + $0x28] sm:$0xff]  ;;  %1477 = vmatprep.subr.bf16.mxu1 %v1667_v10  ;;  %v1839_v16 = vld [vmem:[%s2019_s0 + $0x10] sm:$0xff]   ;;  %v53_v19 = vld [vmem:[%s2020_s1 + $0x38] sm:$0xff] }
  0x13   :  { %1478 = vmatpush3.bf16.msra.mxu1 %v1667_v10  ;;  %v52_v17 = vld [vmem:[%s2020_s1 + $0x30] sm:$0xff]  ;;  %v1670_v18 = vld [vmem:[#allocation2 + $0x28] sm:$0xff]   ;;  %v1857_v21 = vld [vmem:[%s2019_s0 + $0x18] sm:$0xff]  }
  0x14   :  { %1464 = vmatpush3.bf16.msra.mxu0 %v1787_v2  ;;  %1479 = vmatprep.subr.bf16.mxu1 %v1668_v13  ;;  %v1671_v20 = vld [vmem:[%s2022_s3 + $0x30] sm:$0xff]   ;;  %v1672_v22 = vld [vmem:[#allocation2 + $0x20] sm:$0xff]   ;;  %v1673_v23 = vld [vmem:[%s2022_s3 + $0x28] sm:$0xff]  }
  0x15   :  { %1465 = vmatprep.subr.bf16.mxu0 %v1793_v3  ;;  %191 = vperm.xlu0 %1657, %v47_v8   ;;  %v1674_v24 = vld [vmem:[#allocation2 + $0x18] sm:$0xff]   ;;  %v1675_v25 = vld [vmem:[%s2022_s3 + $0x20] sm:$0xff]   ;;  %v1676_v26 = vld [vmem:[#allocation2 + $0x10] sm:$0xff]  }
  0x16   :  { %201 = vperm.xlu1 %1658, %v49_v9   ;;  %v1677_v27 = vld [vmem:[%s2022_s3 + $0x18] sm:$0xff]   ;;  %v1678_v28 = vld [vmem:[#allocation2 + $0x8] sm:$0xff]   ;;  %v1679_v29 = vld [vmem:[%s2022_s3 + $0x10] sm:$0xff]  }
  0x17   :  { %1480 = vmatpush3.bf16.msra.mxu1 %v1668_v13  ;;  %v1680_v30 = vld [vmem:[#allocation2] sm:$0xff]   ;;  %v1681_v31 = vld [vmem:[%s2022_s3 + $0x8] sm:$0xff]   ;;  %v1683_v33 = vld [vmem:[#allocation2 + $0x78] sm:$0xff]  }
  0x18   :  { %1466 = vmatpush3.bf16.msra.mxu0 %v1793_v3  ;;  %1481 = vmatprep.subr.bf16.mxu1 %v1670_v18  ;;  %v1682_v32 = vld [vmem:[%s2022_s3] sm:$0xff]   ;;  %v1684_v52 = vld [vmem:[#allocation2 + $0x70] sm:$0xff]   ;;  %v1685_v57 = vld [vmem:[#allocation2 + $0x68] sm:$0xff]  }
  0x19   :  { %1467 = vmatprep.subr.bf16.mxu0 %v1662_v4  ;;  %206 = vperm.xlu0 %1657, %v50_v12   ;;  %v1686_v0 = vld [vmem:[#allocation2 + $0x60] sm:$0xff]  }
  0x1a   :  { %211 = vperm.xlu1 %1658, %v51_v15  }
  0x1b   :  { %1482 = vmatpush3.bf16.msra.mxu1 %v1670_v18  ;;  %v1288_v18 = vld [vmem:[%s2024_s5] ss:$0 sm:$0xff] }
  0x1c   :  { %1468 = vmatpush3.bf16.msra.mxu0 %v1662_v4  ;;  %1483 = vmatprep.subr.bf16.mxu1 %v1672_v22  ;;  %v1690_v4 = vld [vmem:[#allocation2 + $0x40] sm:$0xff]  }
  0x1d   :  { %1501 = vmatprep.subr.bf16.mxu0 %v1669_v14  ;;  %216 = vperm.xlu0 %1657, %v52_v17  }
  0x1e   :  { %221 = vperm.xlu1 %1658, %v53_v19  }
  0x1f   :  { %1470 = vmatmul.mubr.msk.bf16.vlgmr.msra.gmra.mxu0 %vm106_vm0, %v1825_v11  ;;  %1484 = vmatpush3.bf16.msra.mxu1 %v1672_v22 }
  0x20   :  { %1473 = vmatprep.mubr.msk.bf16.mxu0 %vm106_vm0, %v1839_v16  ;;  %1502 = vmatpush3.bf16.msra.mxu0 %v1669_v14 }
  0x21   :  { %1503 = vmatprep.subr.bf16.mxu0 %v1671_v20  ;;  %1485 = vmatprep.subr.bf16.mxu1 %v1674_v24 }
  0x23   :  { %1486 = vmatpush3.bf16.msra.mxu1 %v1674_v24 }
  0x24   :  { %1504 = vmatpush3.bf16.msra.mxu0 %v1671_v20  ;;  %1487 = vmatprep.subr.bf16.mxu1 %v1676_v26 }
  0x25   :  { %1505 = vmatprep.subr.bf16.mxu0 %v1673_v23 }
  0x27   :  { %1474 = vmatmul.mubr.msk.bf16.gmra.mxu0 %vm106_vm0, %v1857_v21  ;;  %1488 = vmatpush3.bf16.msra.mxu1 %v1676_v26 }
  0x28   :  { %1506 = vmatpush3.bf16.msra.mxu0 %v1673_v23  ;;  %1489 = vmatprep.subr.bf16.mxu1 %v1678_v28 }
  0x29   :  { %1507 = vmatprep.subr.bf16.mxu0 %v1675_v25 }
  0x2b   :  { %1490 = vmatpush3.bf16.msra.mxu1 %v1678_v28 }
  0x2c   :  { %1508 = vmatpush3.bf16.msra.mxu0 %v1675_v25  ;;  %1491 = vmatprep.subr.bf16.mxu1 %v1680_v30 }
  0x2d   :  { %1509 = vmatprep.subr.bf16.mxu0 %v1677_v27 }
  0x2f   :  { %1492 = vmatpush3.bf16.msra.mxu1 %v1680_v30 }
  0x30   :  { %1510 = vmatpush3.bf16.msra.mxu0 %v1677_v27 }
  0x31   :  { %1511 = vmatprep.subr.bf16.mxu0 %v1679_v29 }
  0x32   :  { %1494 = vmatmul.mubr.bf16.vlgmr.msra.gmra.mxu1 %v1793_v3  ;;  %v1689_v3 = vld [vmem:[#allocation2 + $0x48] sm:$0xff]  }
  0x33   :  { %1497 = vmatprep.mubr.bf16.mxu1 %v1787_v2  ;;  %v1688_v2 = vld [vmem:[#allocation2 + $0x50] sm:$0xff]  }
  0x34   :  { %1512 = vmatpush3.bf16.msra.mxu0 %v1679_v29 }
  0x35   :  { %1513 = vmatprep.subr.bf16.mxu0 %v1681_v31 }
  0x38   :  { %1514 = vmatpush3.bf16.msra.mxu0 %v1681_v31 }
  0x39   :  { %1515 = vmatprep.subr.bf16.mxu0 %v1682_v32 }
  0x3a   :  { %1498 = vmatmul.mubr.bf16.gmra.mxu1 %v1782_v1  ;;  %v1687_v1 = vld [vmem:[#allocation2 + $0x58] sm:$0xff]  }
  0x3b   :  { %1533 = vmatprep.mubr.msk.bf16.mxu1 %vm106_vm0, %v1803_v5 }
  0x3c   :  { %1516 = vmatpush3.bf16.msra.mxu0 %v1682_v32 }
  0x3d   :  { %1541 = vmatprep.subr.bf16.mxu0 %v1683_v33 }
  0x8c   :  { %v1886_v35 = vpop.permute.xlu0 %186 }
  0x8d   :  { %v1884_v34 = vpop.permute.xlu1 %196 }
  0x90   :  { %v1890_v39 = vpop.permute.xlu0 %191 }
  0x91   :  { %v1888_v37 = vpop.permute.xlu1 %201 }
  0x94   :  { %v1898_v48 = vpop.permute.xlu0 %206 }
  0x95   :  { %v1893_v43 = vpop.permute.xlu1 %211 }
  0x98   :  { %v1903_v58 = vpop.permute.xlu0 %216 }
  0x99   :  { %v1900_v54 = vpop.permute.xlu1 %221 }
  0xdf   :  { %v1471_v36 = vpop.f32.mrf.mxu0 }
  0xe0   :  { %v226_v46 = vmul.f32 %v1471_v36, %v1884_v34 }
  0xe1   :  { %v153_v38 = vpop.f32.mrf.mxu0 }
  0xe2   :  { %v224_v44 = vmul.f32 %v1886_v35, %v153_v38 }
  0xe3   :  { %v1472_v40 = vpop.f32.mrf.mxu0 }
  0xe4   :  { %v227_v41 = vmul.f32 %v1472_v40, %v1888_v37 }
  0xe5   :  { %v156_v42 = vpop.f32.mrf.mxu0 }
  0xe6   :  { %v225_v45 = vmul.f32 %v1890_v39, %v156_v42  ;;  %v233_v50 = vpack.c.bf16 %v227_v41, %v226_v46 }
  0xe7   :  { %v1475_v47 = vpop.f32.mrf.mxu0 }
  0xe8   :  { %v232_v49 = vpack.c.bf16 %v225_v45, %v224_v44  ;;  %v230_v61 = vmul.f32 %v1475_v47, %v1903_v58 }
  0xe9   :  { %v169_v51 = vpop.f32.mrf.mxu0 }
  0xea   :  { %1517 = vmatprep.mubr.bf16.mxu0 %v232_v49  ;;  %v228_v59 = vmul.f32 %v1898_v48, %v169_v51 }
  0xeb   :  { %v1476_v53 = vpop.f32.mrf.mxu0  ;;  %1518 = vmatmul.mubr.bf16.vlgmr.msra.gmra.mxu0 %v233_v50 }
  0xec   :  { %1542 = vmatpush3.bf16.msra.mxu0 %v1683_v33  ;;  %v231_v55 = vmul.f32 %v1476_v53, %v1900_v54 }
  0xed   :  { %v172_v56 = vpop.f32.mrf.mxu0  ;;  %1543 = vmatprep.subr.bf16.mxu0 %v1684_v52 }
  0xee   :  { %v229_v60 = vmul.f32 %v1893_v43, %v172_v56  ;;  %v235_v63 = vpack.c.bf16 %v231_v55, %v230_v61 }
  0xf0   :  { %v234_v62 = vpack.c.bf16 %v229_v60, %v228_v59  ;;  %1544 = vmatpush3.bf16.msra.mxu0 %v1684_v52 }
  0xf1   :  { %1545 = vmatprep.subr.bf16.mxu0 %v1685_v57 }
  0xf2   :  { %1521 = vmatprep.mubr.bf16.mxu0 %v234_v62  ;;  %v1495_v6 = vpop.f32.mrf.mxu1  ;;  %v1691_v62 = vld [vmem:[%s2022_s3 + $0x78] sm:$0xff]  }
  0xf3   :  { %1522 = vmatmul.mubr.bf16.gmra.mxu0 %v235_v63  ;;  %v1693_v63 = vld [vmem:[%s2022_s3 + $0x68] sm:$0xff]  }
  0xf4   :  { %1546 = vmatpush3.bf16.msra.mxu0 %v1685_v57  ;;  %v350_v7 = vpop.f32.mrf.mxu1 }
  0xf5   :  { %1547 = vmatprep.subr.bf16.mxu0 %v1686_v0 }
  0xf6   :  { %v1496_v8 = vpop.f32.mrf.mxu1 }
  0xf8   :  { %1548 = vmatpush3.bf16.msra.mxu0 %v1686_v0  ;;  %v353_v9 = vpop.f32.mrf.mxu1  ;;  %v1694_v0 = vld [vmem:[%s2022_s3 + $0x60] sm:$0xff]  }
  0xf9   :  { %1549 = vmatprep.subr.bf16.mxu0 %v1687_v1 }
  0xfa   :  { %v1499_v12 = vpop.f32.mrf.mxu1 }
  0xfc   :  { %1550 = vmatpush3.bf16.msra.mxu0 %v1687_v1  ;;  %v366_v20 = vpop.f32.mrf.mxu1  ;;  %v1695_v1 = vld [vmem:[%s2022_s3 + $0x58] sm:$0xff]  }
  0xfd   :  { %1551 = vmatprep.subr.bf16.mxu0 %v1688_v2 }
  0xfe   :  { %v1500_v31 = vpop.f32.mrf.mxu1 }
 0x100   :  { %1552 = vmatpush3.bf16.msra.mxu0 %v1688_v2  ;;  %v369_v47 = vpop.f32.mrf.mxu1  ;;  %v1696_v2 = vld [vmem:[%s2022_s3 + $0x50] sm:$0xff]  }
 0x101   :  { %1553 = vmatprep.subr.bf16.mxu0 %v1689_v3 }
 0x104   :  { %1554 = vmatpush3.bf16.msra.mxu0 %v1689_v3  ;;  %v1697_v3 = vld [vmem:[%s2022_s3 + $0x48] sm:$0xff]  }
 0x105   :  { %1555 = vmatprep.subr.bf16.mxu0 %v1690_v4 }
 0x108   :  { %1556 = vmatpush3.bf16.msra.mxu0 %v1690_v4  ;;  %v1698_v4 = vld [vmem:[%s2022_s3 + $0x40] sm:$0xff]  }
 0x1ab   :  { %v1519_v10 = vpop.f32.mrf.mxu0 }
 0x1ac   :  { %v472_v15 = vadd.f32 %v1519_v10, %v1495_v6  ;;  %v1699_v6 = vld [vmem:[#allocation2 + $0xb8] sm:$0xff]  }
 0x1ad   :  { %v463_v13 = vpop.f32.mrf.mxu0 }
 0x1ae   :  { %v464_v14 = vadd.f32 %v463_v13, %v350_v7  ;;  %v503_v26 = vadd.f32 %v1288_v18, %v472_v15 }
 0x1af   :  { %v1520_v17 = vpop.f32.mrf.mxu0 }
 0x1b0   :  { %v475_v19 = vadd.f32 %v1520_v17, %v1496_v8  ;;  %v501_v23 = vadd.f32 %v1288_v18, %v464_v14  ;;  %v511_v40 = vmax.f32 %v503_v26, 0.0  ;;  %v1701_v26 = vld [vmem:[#allocation2 + $0xa8] sm:$0xff]  }
 0x1b1   :  { %v466_v22 = vpop.f32.mrf.mxu0 }
 0x1b2   :  { %v504_v24 = vadd.f32 %v1288_v18, %v475_v19  ;;  %v467_v25 = vadd.f32 %v466_v22, %v353_v9  ;;  %v509_v33 = vmax.f32 %v501_v23, 0.0  ;;  %v1700_v22 = vld [vmem:[#allocation2 + $0xb0] sm:$0xff]  }
 0x1b3   :  { %v1523_v27 = vpop.f32.mrf.mxu0 }
 0x1b4   :  { %v502_v28 = vadd.f32 %v1288_v18, %v467_v25  ;;  %v488_v29 = vadd.f32 %v1523_v27, %v1499_v12  ;;  %v512_v30 = vmax.f32 %v504_v24, 0.0 }
 0x1b5   :  { %v479_v32 = vpop.f32.mrf.mxu0 }
 0x1b6   :  { %v510_v36 = vmax.f32 %v502_v28, 0.0  ;;  %v480_v38 = vadd.f32 %v479_v32, %v366_v20  ;;  %v507_v42 = vadd.f32 %v1288_v18, %v488_v29  ;;  %v518_v46 = vpack.c.bf16 %v512_v30, %v511_v40  ;;  %v1702_v32 = vld [vmem:[#allocation2 + $0xa0] sm:$0xff]  }
 0x1b7   :  { %v1524_v41 = vpop.f32.mrf.mxu0  ;;  %v1706_v40 = vld [vmem:[#allocation2 + $0x80] sm:$0xff]  }
 0x1b8   :  { %v491_v44 = vadd.f32 %v1524_v41, %v1500_v31  ;;  %v517_v45 = vpack.c.bf16 %v510_v36, %v509_v33  ;;  %v505_v50 = vadd.f32 %v1288_v18, %v480_v38  ;;  %v515_v53 = vmax.f32 %v507_v42, 0.0  ;;  %v1703_v33 = vld [vmem:[#allocation2 + $0x98] sm:$0xff]   ;;  %v1704_v36 = vld [vmem:[#allocation2 + $0x90] sm:$0xff]   ;;  %v1705_v38 = vld [vmem:[#allocation2 + $0x88] sm:$0xff]  }
 0x1b9   :  { %v482_v49 = vpop.f32.mrf.mxu0 }
 0x1ba   :  { %v508_v51 = vadd.f32 %v1288_v18, %v491_v44  ;;  %v483_v52 = vadd.f32 %v482_v49, %v369_v47  ;;  %1557 = vmatprep.mubr.bf16.mxu0 %v517_v45  ;;  %v513_v57 = vmax.f32 %v505_v50, 0.0 }
 0x1bb   :  { %1558 = vmatmul.mubr.bf16.vlgmr.msra.gmra.mxu0 %v518_v46 }
 0x1bc   :  { %v516_v55 = vmax.f32 %v508_v51, 0.0  ;;  %v506_v56 = vadd.f32 %v1288_v18, %v483_v52 }
 0x1be   :  { %v514_v59 = vmax.f32 %v506_v56, 0.0  ;;  %v520_v60 = vpack.c.bf16 %v516_v55, %v515_v53  ;;  %v1326_v53 = vld [vmem:[%s2024_s5 + $0x1] ss:$0 sm:$0xff] }
 0x1c0   :  { %1525 = vmatprep.subr.bf16.mxu1 %v520_v60  ;;  %v519_v61 = vpack.c.bf16 %v514_v59, %v513_v57 }
 0x1c1   :  { %1526 = vmatpush3.bf16.msra.mxu1 %v520_v60 }
 0x1c2   :  { %1527 = vmatprep.subr.bf16.mxu1 %v519_v61  ;;  %1561 = vmatprep.mubr.bf16.mxu0 %v519_v61 }
 0x1c3   :  { %1562 = vmatmul.mubr.bf16.gmra.mxu0 %v520_v60 }
 0x1c4   :  { %1597 = vmatprep.mubr.msk.bf16.mxu0 %vm106_vm0, %v1803_v5  ;;  %v1692_v5 = vld [vmem:[%s2022_s3 + $0x70] sm:$0xff]  }
 0x1c5   :  { %1528 = vmatpush3.bf16.msra.mxu1 %v519_v61 }
 0x1c6   :  { %1529 = vmatprep.subr.bf16.mxu1 %v518_v46 }
 0x1c9   :  { %1530 = vmatpush3.bf16.msra.mxu1 %v518_v46 }
 0x1ca   :  { %1531 = vmatprep.subr.bf16.mxu1 %v517_v45 }
 0x1cd   :  { %1532 = vmatpush3.bf16.msra.mxu1 %v517_v45 }
 0x1ce   :  { %1565 = vmatprep.subr.bf16.mxu1 %v1691_v62 }
 0x1d0   :  { %1534 = vmatmul.mubr.msk.bf16.vlgmr.msra.gmra.mxu1 %vm106_vm0, %v1825_v11 }
 0x1d1   :  { %1537 = vmatprep.mubr.msk.bf16.mxu1 %vm106_vm0, %v1839_v16  ;;  %1566 = vmatpush3.bf16.msra.mxu1 %v1691_v62 }
 0x1d2   :  { %1567 = vmatprep.subr.bf16.mxu1 %v1692_v5 }
 0x1d5   :  { %1568 = vmatpush3.bf16.msra.mxu1 %v1692_v5 }
 0x1d6   :  { %1569 = vmatprep.subr.bf16.mxu1 %v1693_v63 }
 0x1d8   :  { %1538 = vmatmul.mubr.msk.bf16.gmra.mxu1 %vm106_vm0, %v1857_v21 }
 0x1d9   :  { %1570 = vmatpush3.bf16.msra.mxu1 %v1693_v63 }
 0x1da   :  { %1571 = vmatprep.subr.bf16.mxu1 %v1694_v0 }
 0x1dd   :  { %1572 = vmatpush3.bf16.msra.mxu1 %v1694_v0 }
 0x1de   :  { %1573 = vmatprep.subr.bf16.mxu1 %v1695_v1 }
 0x1e1   :  { %1574 = vmatpush3.bf16.msra.mxu1 %v1695_v1 }
 0x1e2   :  { %1575 = vmatprep.subr.bf16.mxu1 %v1696_v2 }
 0x1e5   :  { %1576 = vmatpush3.bf16.msra.mxu1 %v1696_v2 }
 0x1e6   :  { %1577 = vmatprep.subr.bf16.mxu1 %v1697_v3 }
 0x1e9   :  { %1578 = vmatpush3.bf16.msra.mxu1 %v1697_v3 }
 0x1ea   :  { %1579 = vmatprep.subr.bf16.mxu1 %v1698_v4 }
 0x1ed   :  { %1580 = vmatpush3.bf16.msra.mxu1 %v1698_v4 }
 0x1ee   :  { %1605 = vmatprep.subr.bf16.mxu1 %v1699_v6 }
 0x27b   :  { %v1559_v41 = vpop.f32.mrf.mxu0 }
 0x27d   :  { %v714_v42 = vpop.f32.mrf.mxu0 }
 0x27f   :  { %v1560_v44 = vpop.f32.mrf.mxu0 }
 0x281   :  { %v717_v45 = vpop.f32.mrf.mxu0 }
 0x283   :  { %v1563_v47 = vpop.f32.mrf.mxu0 }
 0x285   :  { %v730_v56 = vpop.f32.mrf.mxu0 }
 0x287   :  { %v1564_v1 = vpop.f32.mrf.mxu0 }
 0x290   :  { %v1535_v7 = vpop.f32.mrf.mxu1 }
 0x291   :  { %v588_v15 = vmul.f32 %v1535_v7, %v1884_v34 }
 0x292   :  { %v555_v8 = vpop.f32.mrf.mxu1 }
 0x293   :  { %v586_v13 = vmul.f32 %v555_v8, %v1886_v35 }
 0x294   :  { %v1536_v9 = vpop.f32.mrf.mxu1 }
 0x295   :  { %v589_v10 = vmul.f32 %v1536_v9, %v1888_v37 }
 0x296   :  { %v558_v12 = vpop.f32.mrf.mxu1 }
 0x297   :  { %v587_v14 = vmul.f32 %v558_v12, %v1890_v39  ;;  %v595_v19 = vpack.c.bf16 %v589_v10, %v588_v15 }
 0x298   :  { %v1539_v17 = vpop.f32.mrf.mxu1 }
 0x299   :  { %v594_v18 = vpack.c.bf16 %v587_v14, %v586_v13  ;;  %v592_v29 = vmul.f32 %v1539_v17, %v1903_v58  ;;  %v733_v14 = vpop.f32.mrf.mxu0 }
 0x29a   :  { %v571_v20 = vpop.f32.mrf.mxu1 }
 0x29b   :  { %1581 = vmatprep.mubr.bf16.mxu1 %v594_v18  ;;  %v590_v27 = vmul.f32 %v571_v20, %v1898_v48 }
 0x29c   :  { %v1540_v23 = vpop.f32.mrf.mxu1  ;;  %1582 = vmatmul.mubr.bf16.vlgmr.msra.gmra.mxu1 %v595_v19 }
 0x29d   :  { %1606 = vmatpush3.bf16.msra.mxu1 %v1699_v6  ;;  %v593_v24 = vmul.f32 %v1540_v23, %v1900_v54 }
 0x29e   :  { %v574_v25 = vpop.f32.mrf.mxu1  ;;  %1607 = vmatprep.subr.bf16.mxu1 %v1700_v22 }
 0x29f   :  { %v591_v28 = vmul.f32 %v574_v25, %v1893_v43  ;;  %v597_v31 = vpack.c.bf16 %v593_v24, %v592_v29  ;;  %v1707_v29 = vld [vmem:[%s2022_s3 + $0xb8] sm:$0xff]  }
 0x2a1   :  { %v596_v30 = vpack.c.bf16 %v591_v28, %v590_v27  ;;  %1608 = vmatpush3.bf16.msra.mxu1 %v1700_v22 }
 0x2a2   :  { %1609 = vmatprep.subr.bf16.mxu1 %v1701_v26 }
 0x2a3   :  { %1585 = vmatprep.mubr.bf16.mxu1 %v596_v30  ;;  %v1708_v30 = vld [vmem:[%s2022_s3 + $0xb0] sm:$0xff]  }
 0x2a4   :  { %1586 = vmatmul.mubr.bf16.gmra.mxu1 %v597_v31  ;;  %v1712_v31 = vld [vmem:[%s2022_s3 + $0x90] sm:$0xff]  }
 0x2a5   :  { %1610 = vmatpush3.bf16.msra.mxu1 %v1701_v26 }
 0x2a6   :  { %1611 = vmatprep.subr.bf16.mxu1 %v1702_v32 }
 0x2a9   :  { %1612 = vmatpush3.bf16.msra.mxu1 %v1702_v32  ;;  %v1713_v32 = vld [vmem:[%s2022_s3 + $0x88] sm:$0xff]  }
 0x2aa   :  { %1613 = vmatprep.subr.bf16.mxu1 %v1703_v33 }
 0x2ad   :  { %1614 = vmatpush3.bf16.msra.mxu1 %v1703_v33  ;;  %v1714_v33 = vld [vmem:[%s2022_s3 + $0x80] sm:$0xff]  }
 0x2ae   :  { %1615 = vmatprep.subr.bf16.mxu1 %v1704_v36 }
 0x2b1   :  { %1616 = vmatpush3.bf16.msra.mxu1 %v1704_v36 }
 0x2b2   :  { %1617 = vmatprep.subr.bf16.mxu1 %v1705_v38 }
 0x2b5   :  { %1618 = vmatpush3.bf16.msra.mxu1 %v1705_v38 }
 0x2b6   :  { %1619 = vmatprep.subr.bf16.mxu1 %v1706_v40 }
 0x2b9   :  { %1620 = vmatpush3.bf16.msra.mxu1 %v1706_v40 }
 0x35c   :  { %v1583_v46 = vpop.f32.mrf.mxu1 }
 0x35d   :  { %v836_v51 = vadd.f32 %v1583_v46, %v1559_v41 }
 0x35e   :  { %v827_v49 = vpop.f32.mrf.mxu1 }
 0x35f   :  { %v828_v50 = vadd.f32 %v827_v49, %v714_v42  ;;  %v868_v62 = vadd.f32 %v1326_v53, %v836_v51 }
 0x360   :  { %v1584_v52 = vpop.f32.mrf.mxu1 }
 0x361   :  { %v839_v55 = vadd.f32 %v1584_v52, %v1560_v44  ;;  %v866_v59 = vadd.f32 %v1326_v53, %v828_v50  ;;  %v876_v8 = vmax.f32 %v868_v62, 0.0 }
 0x362   :  { %v830_v57 = vpop.f32.mrf.mxu1 }
 0x363   :  { %v869_v60 = vadd.f32 %v1326_v53, %v839_v55  ;;  %v831_v61 = vadd.f32 %v830_v57, %v717_v45  ;;  %v874_v4 = vmax.f32 %v866_v59, 0.0 }
 0x364   :  { %v1587_v5 = vpop.f32.mrf.mxu1 }
 0x365   :  { %v867_v63 = vadd.f32 %v1326_v53, %v831_v61  ;;  %v852_v0 = vadd.f32 %v1587_v5, %v1563_v47  ;;  %v877_v2 = vmax.f32 %v869_v60, 0.0 }
 0x366   :  { %v843_v3 = vpop.f32.mrf.mxu1 }
 0x367   :  { %v875_v6 = vmax.f32 %v867_v63, 0.0  ;;  %v844_v7 = vadd.f32 %v843_v3, %v730_v56  ;;  %v872_v10 = vadd.f32 %v1326_v53, %v852_v0  ;;  %v883_v15 = vpack.c.bf16 %v877_v2, %v876_v8 }
 0x368   :  { %v1588_v9 = vpop.f32.mrf.mxu1 }
 0x369   :  { %v855_v12 = vadd.f32 %v1588_v9, %v1564_v1  ;;  %v882_v13 = vpack.c.bf16 %v875_v6, %v874_v4  ;;  %v870_v18 = vadd.f32 %v1326_v53, %v844_v7  ;;  %v880_v22 = vmax.f32 %v872_v10, 0.0 }
 0x36a   :  { %v846_v17 = vpop.f32.mrf.mxu1 }
 0x36b   :  { %v873_v19 = vadd.f32 %v1326_v53, %v855_v12  ;;  %v847_v20 = vadd.f32 %v846_v17, %v733_v14  ;;  %1621 = vmatprep.mubr.bf16.mxu1 %v882_v13  ;;  %v878_v25 = vmax.f32 %v870_v18, 0.0 }
 0x36c   :  { %1622 = vmatmul.mubr.bf16.vlgmr.msra.gmra.mxu1 %v883_v15 }
 0x36d   :  { %v881_v23 = vmax.f32 %v873_v19, 0.0  ;;  %v871_v24 = vadd.f32 %v1326_v53, %v847_v20 }
 0x36f   :  { %v879_v26 = vmax.f32 %v871_v24, 0.0  ;;  %v885_v27 = vpack.c.bf16 %v881_v23, %v880_v22 }
 0x371   :  { %1589 = vmatprep.subr.bf16.mxu0 %v885_v27  ;;  %v884_v28 = vpack.c.bf16 %v879_v26, %v878_v25 }
 0x372   :  { %1590 = vmatpush3.bf16.msra.mxu0 %v885_v27 }
 0x373   :  { %1591 = vmatprep.subr.bf16.mxu0 %v884_v28  ;;  %1625 = vmatprep.mubr.bf16.mxu1 %v884_v28 }
 0x374   :  { %1626 = vmatmul.mubr.bf16.gmra.mxu1 %v885_v27 }
 0x376   :  { %1592 = vmatpush3.bf16.msra.mxu0 %v884_v28 }
 0x377   :  { %1593 = vmatprep.subr.bf16.mxu0 %v883_v15 }
 0x37a   :  { %1594 = vmatpush3.bf16.msra.mxu0 %v883_v15 }
 0x37b   :  { %1595 = vmatprep.subr.bf16.mxu0 %v882_v13 }
 0x37e   :  { %1596 = vmatpush3.bf16.msra.mxu0 %v882_v13 }
 0x37f   :  { %1629 = vmatprep.subr.bf16.mxu0 %v1707_v29 }
 0x381   :  { %1598 = vmatmul.mubr.msk.bf16.vlgmr.msra.gmra.mxu0 %vm106_vm0, %v1825_v11  ;;  %v1709_v11 = vld [vmem:[%s2022_s3 + $0xa8] sm:$0xff]  }
 0x382   :  { %1601 = vmatprep.mubr.msk.bf16.mxu0 %vm106_vm0, %v1839_v16  ;;  %1630 = vmatpush3.bf16.msra.mxu0 %v1707_v29  ;;  %v1710_v16 = vld [vmem:[%s2022_s3 + $0xa0] sm:$0xff]  }
 0x383   :  { %1631 = vmatprep.subr.bf16.mxu0 %v1708_v30 }
 0x386   :  { %1632 = vmatpush3.bf16.msra.mxu0 %v1708_v30 }
 0x387   :  { %1633 = vmatprep.subr.bf16.mxu0 %v1709_v11 }
 0x389   :  { %1602 = vmatmul.mubr.msk.bf16.gmra.mxu0 %vm106_vm0, %v1857_v21  ;;  %v1711_v21 = vld [vmem:[%s2022_s3 + $0x98] sm:$0xff]  }
 0x38a   :  { %1634 = vmatpush3.bf16.msra.mxu0 %v1709_v11 }
 0x38b   :  { %1635 = vmatprep.subr.bf16.mxu0 %v1710_v16 }
 0x38e   :  { %1636 = vmatpush3.bf16.msra.mxu0 %v1710_v16 }
 0x38f   :  { %1637 = vmatprep.subr.bf16.mxu0 %v1711_v21 }
 0x392   :  { %1638 = vmatpush3.bf16.msra.mxu0 %v1711_v21 }
 0x393   :  { %1639 = vmatprep.subr.bf16.mxu0 %v1712_v31 }
 0x396   :  { %1640 = vmatpush3.bf16.msra.mxu0 %v1712_v31 }
 0x397   :  { %1641 = vmatprep.subr.bf16.mxu0 %v1713_v32 }
 0x39a   :  { %1642 = vmatpush3.bf16.msra.mxu0 %v1713_v32 }
 0x39b   :  { %1643 = vmatprep.subr.bf16.mxu0 %v1714_v33 }
 0x39e   :  { %1644 = vmatpush3.bf16.msra.mxu0 %v1714_v33 }
 0x441   :  { %v1599_v36 = vpop.f32.mrf.mxu0 }
 0x442   :  { %v953_v46 = vmul.f32 %v1599_v36, %v1884_v34  ;;  %v1623_v34 = vpop.f32.mrf.mxu1 }
 0x443   :  { %v920_v38 = vpop.f32.mrf.mxu0 }
 0x444   :  { %v951_v44 = vmul.f32 %v920_v38, %v1886_v35  ;;  %v1079_v59 = vpop.f32.mrf.mxu1 }
 0x445   :  { %v1600_v40 = vpop.f32.mrf.mxu0 }
 0x446   :  { %v954_v41 = vmul.f32 %v1600_v40, %v1888_v37  ;;  %v1624_v60 = vpop.f32.mrf.mxu1 }
 0x447   :  { %v923_v42 = vpop.f32.mrf.mxu0 }
 0x448   :  { %v952_v45 = vmul.f32 %v923_v42, %v1890_v39  ;;  %v960_v50 = vpack.c.bf16 %v954_v41, %v953_v46  ;;  %v1082_v61 = vpop.f32.mrf.mxu1 }
 0x449   :  { %v1603_v47 = vpop.f32.mrf.mxu0 }
 0x44a   :  { %v959_v49 = vpack.c.bf16 %v952_v45, %v951_v44  ;;  %v957_v35 = vmul.f32 %v1603_v47, %v1903_v58  ;;  %v1627_v63 = vpop.f32.mrf.mxu1 }
 0x44b   :  { %v936_v51 = vpop.f32.mrf.mxu0 }
 0x44c   :  { %1645 = vmatprep.mubr.bf16.mxu0 %v959_v49  ;;  %v955_v56 = vmul.f32 %v936_v51, %v1898_v48  ;;  %v1095_v4 = vpop.f32.mrf.mxu1 }
 0x44d   :  { %v1604_v52 = vpop.f32.mrf.mxu0  ;;  %1646 = vmatmul.mubr.bf16.vlgmr.msra.gmra.mxu0 %v960_v50 }
 0x44e   :  { %v958_v53 = vmul.f32 %v1604_v52, %v1900_v54  ;;  %v1364_v54 = vld [vmem:[%s2024_s5 + $0x2] ss:$0 sm:$0xff]  ;;  %v1628_v15 = vpop.f32.mrf.mxu1 }
 0x44f   :  { %v939_v55 = vpop.f32.mrf.mxu0 }
 0x450   :  { %v956_v37 = vmul.f32 %v939_v55, %v1893_v43  ;;  %v962_v39 = vpack.c.bf16 %v958_v53, %v957_v35  ;;  %v1098_v26 = vpop.f32.mrf.mxu1 }
 0x452   :  { %v961_v57 = vpack.c.bf16 %v956_v37, %v955_v56 }
 0x454   :  { %1649 = vmatprep.mubr.bf16.mxu0 %v961_v57 }
 0x455   :  { %1650 = vmatmul.mubr.bf16.gmra.mxu0 %v962_v39 }
 0x50d   :  { %v1647_v62 = vpop.f32.mrf.mxu0 }
 0x50e   :  { %v1201_v5 = vadd.f32 %v1647_v62, %v1623_v34 }
 0x50f   :  { %v1192_v48 = vpop.f32.mrf.mxu0 }
 0x510   :  { %v1233_v0 = vadd.f32 %v1364_v54, %v1201_v5  ;;  %v1193_v43 = vadd.f32 %v1192_v48, %v1079_v59 }
 0x511   :  { %v1648_v1 = vpop.f32.mrf.mxu0 }
 0x512   :  { %v1241_v58 = vmax.f32 %v1233_v0, 0.0  ;;  %v1231_v2 = vadd.f32 %v1364_v54, %v1193_v43  ;;  %v1204_v3 = vadd.f32 %v1648_v1, %v1624_v60 }
 0x513   :  { %v1195_v6 = vpop.f32.mrf.mxu0 }
 0x514   :  { %1249 = vst [vmem:[%s2025_s6 + $0x10] sm:$0xff] %v1241_v58  ;;  %v1239_v7 = vmax.f32 %v1231_v2, 0.0  ;;  %v1234_v8 = vadd.f32 %v1364_v54, %v1204_v3  ;;  %v1196_v9 = vadd.f32 %v1195_v6, %v1082_v61 }
 0x515   :  { %v1651_v10 = vpop.f32.mrf.mxu0 }
 0x516   :  { %1247 = vst [vmem:[%s2025_s6] sm:$0xff] %v1239_v7  ;;  %v1242_v12 = vmax.f32 %v1234_v8, 0.0  ;;  %v1232_v13 = vadd.f32 %v1364_v54, %v1196_v9  ;;  %v1217_v14 = vadd.f32 %v1651_v10, %v1627_v63 }
 0x517   :  { %v1208_v17 = vpop.f32.mrf.mxu0 }
 0x518   :  { %1250 = vst [vmem:[%s2025_s6 + $0x18] sm:$0xff] %v1242_v12  ;;  %v1240_v18 = vmax.f32 %v1232_v13, 0.0  ;;  %v1237_v19 = vadd.f32 %v1364_v54, %v1217_v14  ;;  %v1209_v20 = vadd.f32 %v1208_v17, %v1095_v4 }
 0x519   :  { %v1652_v22 = vpop.f32.mrf.mxu0 }
 0x51a   :  { %1248 = vst [vmem:[%s2025_s6 + $0x8] sm:$0xff] %v1240_v18  ;;  %v1245_v23 = vmax.f32 %v1237_v19, 0.0  ;;  %v1235_v24 = vadd.f32 %v1364_v54, %v1209_v20  ;;  %v1220_v25 = vadd.f32 %v1652_v22, %v1628_v15 }
 0x51b   :  { %v1211_v27 = vpop.f32.mrf.mxu0 }
 0x51c   :  { %1253 = vst [vmem:[%s2025_s6 + $0x30] sm:$0xff] %v1245_v23  ;;  %v1243_v28 = vmax.f32 %v1235_v24, 0.0  ;;  %v1238_v29 = vadd.f32 %v1364_v54, %v1220_v25  ;;  %v1212_v30 = vadd.f32 %v1211_v27, %v1098_v26 }
 0x51e   :  { %1251 = vst [vmem:[%s2025_s6 + $0x20] sm:$0xff] %v1243_v28  ;;  %v1246_v11 = vmax.f32 %v1238_v29, 0.0  ;;  %v1236_v16 = vadd.f32 %v1364_v54, %v1212_v30 }
 0x520   :  { %1254 = vst [vmem:[%s2025_s6 + $0x38] sm:$0xff] %v1246_v11  ;;  %v1244_v21 = vmax.f32 %v1236_v16, 0.0 }
 0x522   :  { %1252 = vst [vmem:[%s2025_s6 + $0x28] sm:$0xff] %v1244_v21 }
 0x523   :  { %1259 = vsyncpa [#allocation3], 1 }

</bundles_post_ra>
